<compile_context>
chip_gen: v7x
topology: tpu7x:2x2x1
jax: 0.10.0
libtpu: 0.0.40
codegen_flags: <defaults>
</compile_context>

<pallas_src>
import re
import functools
from typing import List

import numpy as np
import jax
import jax.numpy as jnp
from jax.experimental import pallas as pl
from jax.experimental.pallas import tpu as pltpu


# --------------------------------------------------------------------------
# Vocabulary extraction (host-side Python glue, mirrors the PyTorch script)
# --------------------------------------------------------------------------
_CORPUS = ['Computer science drives innovation through efficient algorithms and programming languages.', 'Civil engineering designs safe and sustainable structures for modern cities.', 'Software development in computer science supports automated systems in civil engineering projects.', 'Computer algorithms optimize construction schedules and resource allocation in civil engineering.', 'Data analysis in computer science helps predict infrastructure performance and safety.', 'Civil engineers use advanced software to model stress and load on bridges.', 'Computer science innovations lead to better simulation tools for civil engineering design.', 'Robust algorithms ensure reliability in both software systems and civil infrastructure monitoring.', 'Computer science supports the development of smart sensors for monitoring structural health.', 'Civil engineering integrates modern materials with technology to build resilient structures.', 'Advanced computing models simulate earthquake impacts on civil infrastructure.', 'Computer science techniques enhance the design and analysis of civil structures.', 'Civil engineering projects benefit from data analytics and machine learning algorithms.', 'Simulation software developed in computer science aids in stress testing bridges.', 'Computer programming skills are essential for modern civil engineering research.', 'Civil engineering uses geographic information systems powered by computer algorithms.', 'Big data in computer science improves decision-making in large-scale construction projects.', 'Civil engineers rely on software simulations to predict traffic flow and bridge behavior.', 'Machine learning in computer science analyzes structural data from sensors in buildings.', 'Civil engineering designs are enhanced by computer-aided drafting and modeling software.', 'Computer networks enable real-time monitoring of civil infrastructure and urban systems.', 'Civil engineering relies on statistical models developed through computer science to ensure safety.', 'Algorithm development in computer science speeds up simulation processes in civil engineering tasks.', 'Civil engineering and computer science collaborate to create innovative, sustainable urban solutions.', 'Data visualization tools from computer science help civil engineers understand project progress.', 'Computer simulations predict soil behavior and stress distribution in civil construction projects.', 'Civil engineering standards are updated using insights from computer-based data analysis.', 'Computer science improves infrastructure planning with high-speed data processing and smart algorithms.', 'Civil engineers integrate sensors and computer systems to monitor bridge health continuously.', 'Artificial intelligence in computer science enhances the efficiency of civil engineering designs.', 'Civil engineering projects benefit from computer-aided structural analysis and real-time monitoring systems.', 'Computer science methodologies simplify complex calculations for civil engineering load assessments.', 'Civil engineers use digital models created by computer science to simulate water flow in dams.', 'Computer programming enables the automation of monitoring systems in large civil engineering projects.', 'Civil engineering relies on simulation software from computer science for earthquake and flood analysis.', 'Computer science research drives innovations that improve the materials used in civil engineering construction.', 'Civil engineering designs incorporate computational tools from computer science for precise planning.', 'Machine learning models in computer science predict the longevity of civil infrastructure components.', 'Civil engineering safety measures improve with computer-driven data analysis and predictive modeling.', 'Computer science contributes to civil engineering by optimizing construction management and workflow scheduling.', 'Civil engineers design energy-efficient buildings with assistance from computer simulation and thermal analysis.', 'Computer science tools automate routine tasks, freeing civil engineers to focus on innovative design challenges.', 'Civil engineering uses digital mapping and computer-aided design to create detailed construction blueprints.', 'Computer vision algorithms help analyze structural images and detect issues in civil engineering projects.', 'Civil engineers depend on reliable software developed through computer science for design and project management.', 'Computer science innovations enhance virtual reality training for civil engineering workers on construction sites.', 'Civil engineering challenges are solved using computer algorithms that optimize design parameters and improve efficiency.', 'Computer science principles support the development of smart cities with efficient civil engineering infrastructures.', 'Civil engineering integrates environmental analysis and computer models to design sustainable urban areas.', 'Computer science and civil engineering together innovate, creating advanced solutions for construction, sustainability, and urban development.']


def tokenize(document: str) -> List[str]:
    return re.findall(r"\w+", document.lower())


def extract_vocabulary(corpus: List[str]) -> List[str]:
    vocabulary = [token for document in corpus for token in tokenize(document)]
    return sorted(list(set(vocabulary)))


VOCAB = extract_vocabulary(_CORPUS)
IN_FEATURES = 10
OUT_FEATURES = len(VOCAB)

LANE = 128
SUBLANE = 8


def _round_up(x: int, m: int) -> int:
    return ((x + m - 1) // m) * m


# --------------------------------------------------------------------------
# Pallas kernel: fused linear layer  y = x @ W_T + b   (one row-tile per step)
# --------------------------------------------------------------------------
def _linear_kernel(x_ref, wt_ref, b_ref, o_ref):
    # MXU matmul with f32 accumulation; bias add is a single VPU op riding
    # under the output-store slack.  Nothing else to optimize here: the
    # kernel is HBM-write-bound.
    y = jnp.dot(x_ref[...], wt_ref[...], preferred_element_type=jnp.float32)
    o_ref[...] = (y + b_ref[...]).astype(o_ref.dtype)


def prepare_params(weight, bias):
    """One-time conversion from PyTorch layout (V, 10), (V,) to the kernel's
    resident layout: pre-transposed (10, V) and a (1, V) bias row.
    Do this once at init time, NOT per forward call."""
    wt = jnp.asarray(weight, jnp.float32).T          # (10, V)
    b = jnp.asarray(bias, jnp.float32).reshape(1, -1)  # (1, V)
    return wt, b


@functools.partial(jax.jit, static_argnames=("tile_n",))
def context_layer_forward(x, wt, b, *, tile_n: int = 2048):
    """x: (N, 10) f32; wt: (10, V) f32; b: (1, V) f32.
    Returns (N, V) f32 — identical semantics to nn.Linear(10, V)."""
    n, k = x.shape
    v = wt.shape[1]

    # Row-tile selection: multiple of 8 (sublane-dense), clamped for small N.
    # Large default (2048) amortizes the ~0.35us/grid-step pipeline overhead;
    # the grid need not divide N — Pallas handles the partial boundary block
    # (OOB output rows are discarded), so there is NO host-side pad or slice.
    if n < SUBLANE:
        tn = n                                   # block == full array dim
    else:
        tn = min(tile_n, (n // SUBLANE) * SUBLANE)
    grid_n = pl.cdiv(n, tn)

    # VMEM budget for this tile (double-buffered x & out; resident wt/bias
    # still get a second buffer).  Lane/sublane padding of the VMEM layout is
    # accounted for.  Always >= the 32 MiB default scope, capped at v7x's
    # 64 MiB physical VMEM.
    v_pad = _round_up(v, LANE)
    need = (2 * tn * LANE * 4                      # x blocks (lane-padded)
            + 2 * tn * v_pad * 4                   # out blocks
            + 2 * _round_up(k, SUBLANE) * v_pad * 4  # W_T
            + 2 * SUBLANE * v_pad * 4)             # bias
    vmem_limit = int(min(64 * 1024 * 1024, max(need + (2 << 20), 32 * 1024 * 1024)))

    cost = pl.CostEstimate(
        flops=2 * n * k * v,
        transcendentals=0,
        bytes_accessed=n * k * 4 + k * v * 4 + v * 4 + n * v * 4,
    )

    return pl.pallas_call(
        _linear_kernel,
        out_shape=jax.ShapeDtypeStruct((n, v), jnp.float32),
        grid=(grid_n,),
        in_specs=[
            # x: tiled over rows
            pl.BlockSpec((tn, k), lambda i: (i, 0)),
            # W_T: whole array, constant index map -> stays resident in VMEM
            pl.BlockSpec((k, v), lambda i: (0, 0)),
            # bias row: whole array, resident
            pl.BlockSpec((1, v), lambda i: (0, 0)),
        ],
        # Exact-V output: block width == full array dim (allowed by the
        # (8,128) rule); avoids writing padding bytes and the host column
        # slice, at the cost of one masked vst on the final partial vreg.
        out_specs=pl.BlockSpec((tn, v), lambda i: (i, 0)),
        compiler_params=pltpu.CompilerParams(
            dimension_semantics=("parallel",),
            vmem_limit_bytes=vmem_limit),
        cost_estimate=cost,
    )(x, wt, b)


# --------------------------------------------------------------------------
# Deterministic parameter init (matches nn.Linear init distribution bounds)
# --------------------------------------------------------------------------
def init_params(key):
    kw, kb = jax.random.split(key)
    bound = 1.0 / np.sqrt(IN_FEATURES)
    weight = jax.random.uniform(kw, (OUT_FEATURES, IN_FEATURES),
                                minval=-bound, maxval=bound, dtype=jnp.float32)
    bias = jax.random.uniform(kb, (OUT_FEATURES,),
                              minval=-bound, maxval=bound, dtype=jnp.float32)
    return weight, bias


if __name__ == "__main__":
    key = jax.random.PRNGKey(0)
    k_x, k_p = jax.random.split(key)

    batch = 8  # small synthetic batch (stand-in for encoded_skipped rows)
    x = jax.random.normal(k_x, (batch, IN_FEATURES), dtype=jnp.float32)
    weight, bias = init_params(k_p)

    # One-time layout prep (transpose + bias row), cached across calls.
    wt, b = prepare_params(weight, bias)
    wt = jax.block_until_ready(wt)
    b = jax.block_until_ready(b)

    out = context_layer_forward(x, wt, b)
    out = jax.block_until_ready(out)

    # Sanity check against pure-JAX reference of the PyTorch forward.
    ref = x @ weight.T + bias
    np.testing.assert_allclose(np.asarray(out), np.asarray(ref),
                               rtol=1e-5, atol=1e-5)

    assert out.shape == (batch, OUT_FEATURES)
    print("KERNEL_OK")
</pallas_src>

<mosaic_0001>
module attributes {stable_mosaic.version = 11 : i64} {
  func.func @_linear_kernel(%arg0: i32, %arg1: memref<8x10xf32, #tpu.memory_space<vmem>>, %arg2: memref<10x213xf32, #tpu.memory_space<vmem>>, %arg3: memref<1x213xf32, #tpu.memory_space<vmem>>, %arg4: memref<8x213xf32, #tpu.memory_space<vmem>>) attributes {dimension_semantics = [#tpu.dimension_semantics<parallel>], iteration_bounds = array<i64: 1>, scalar_prefetch = 0 : i64, scratch_operands = 0 : i64, tpu.core_type = #tpu.core_type<tc>, window_params = [{transform_indices = @transform_0, window_bounds = array<i64: 8, 10>}, {pipeline_mode = #tpu.pipeline_mode<synchronous>, transform_indices = @transform_1, window_bounds = array<i64: 10, 213>}, {pipeline_mode = #tpu.pipeline_mode<synchronous>, transform_indices = @transform_2, window_bounds = array<i64: 1, 213>}, {transform_indices = @transform_3, window_bounds = array<i64: 8, 213>}]} {
    %c0 = arith.constant 0 : index
    %c0_0 = arith.constant 0 : index
    %0 = vector.load %arg1[%c0, %c0_0] : memref<8x10xf32, #tpu.memory_space<vmem>>, vector<8x10xf32>
    %c0_1 = arith.constant 0 : index
    %c0_2 = arith.constant 0 : index
    %1 = vector.load %arg2[%c0_1, %c0_2] : memref<10x213xf32, #tpu.memory_space<vmem>>, vector<10x213xf32>
    %cst = arith.constant dense<0.000000e+00> : vector<8x213xf32>
    %2 = tpu.matmul %0, %1, %cst {dimension_numbers = #tpu.dot_dimension_numbers<[1], [0], [0], [1], [0, 0, 1, 1], [], []>} : vector<8x10xf32>, vector<10x213xf32>, vector<8x213xf32> -> vector<8x213xf32>
    %c0_3 = arith.constant 0 : index
    %c0_4 = arith.constant 0 : index
    %3 = vector.load %arg3[%c0_3, %c0_4] : memref<1x213xf32, #tpu.memory_space<vmem>>, vector<1x213xf32>
    %4 = vector.broadcast %3 : vector<1x213xf32> to vector<8x213xf32>
    %5 = arith.addf %2, %4 : vector<8x213xf32>
    %c0_5 = arith.constant 0 : index
    %c0_6 = arith.constant 0 : index
    %6 = vector.load %arg4[%c0_5, %c0_6] : memref<8x213xf32, #tpu.memory_space<vmem>>, vector<8x213xf32>
    tpu.vector_store %arg4[%c0_5, %c0_6], %5 {strides = array<i32>} : memref<8x213xf32, #tpu.memory_space<vmem>>, vector<8x213xf32>,
    return
  }
  func.func @transform_0(%arg0: i32) -> (i32, i32) {
    %c0_i32 = arith.constant 0 : i32
    %c0_i32_0 = arith.constant 0 : i32
    return %arg0, %c0_i32 : i32, i32
  }
  func.func @transform_1(%arg0: i32) -> (i32, i32) {
    %c0_i32 = arith.constant 0 : i32
    %c0_i32_0 = arith.constant 0 : i32
    %c0_i32_1 = arith.constant 0 : i32
    return %c0_i32, %c0_i32_0 : i32, i32
  }
  func.func @transform_2(%arg0: i32) -> (i32, i32) {
    %c0_i32 = arith.constant 0 : i32
    %c0_i32_0 = arith.constant 0 : i32
    %c0_i32_1 = arith.constant 0 : i32
    return %c0_i32, %c0_i32_0 : i32, i32
  }
  func.func @transform_3(%arg0: i32) -> (i32, i32) {
    %c0_i32 = arith.constant 0 : i32
    %c0_i32_0 = arith.constant 0 : i32
    return %arg0, %c0_i32 : i32, i32
  }
}

</mosaic_0001>

<bundles_post_ra>
// kernel: context_layer_forward.1
= control target key start
LH: loop header
LB: loop body
LE: loop exit
PB: predicated region body
PF: predicated region fallthrough
CT: control target
= control target key end

     0   :  { %8 = vsyncpa [#allocation3], 0  ;;  %s320_s0 = inlined_call_operand.hbm [shape: f32[8,10], index: 0, kind: input, shape index: {}]   ;;  %s321_s1 = inlined_call_operand.hbm [shape: f32[10,213], index: 1, kind: input, shape index: {}]   ;;  %s322_s2 = inlined_call_operand.vmem [shape: f32[1,213], index: 2, kind: input, shape index: {}]   ;;  %s323_s3 = inlined_call_operand.hbm [shape: f32[8,213], index: 3, kind: output, shape index: {}]  }
   0x1   :  { %9 = vsyncpa [#allocation6], 0 }
   0x2   :  { %10 = vsyncpa [#allocation4], 0  ;;  %s247_s12 = smov [#allocation2]   ;;  %s248_s14 = smov [#allocation5]  }
   0x3   :  { %s17_s13 = sshll.u32 %s247_s12, 4  ;;  %s26_s15 = sshll.u32 %s248_s14, 4  ;;  %s18_s13 = int_to_ptr.vmem [resolvable:$true] %s17_s13  ;;  %s274_s15 = int_to_ptr.vmem [resolvable:$true] %s26_s15 }
   0x4   :  { %s175_s18 = scalar_lea.hbm %s320_s0, 128 }
   0x5   :  { %p176_p0 = scmp.ne.s32.totalorder %s320_s0, %s175_s18  ;;  %p179_p1 = scmp.lt.u32.totalorder %s175_s18, %s320_s0 }
   0x7   :  { %p181_p2 = pnand %p179_p1, %p176_p0 }
   0x9   :  { %184 = shalt.err (!%p181_p2)
}
   0xa   :  { %s185_s23 = scalar_lea.vmem %s18_s13, 128  ;;  %p190_p4 = scmp.lt.s32.totalorder %s18_s13, %s18_s13 }
   0xb   :  { %p186_p3 = scmp.ne.s32.totalorder %s18_s13, %s185_s23  ;;  %p191_p5 = scmp.lt.s32.totalorder %s185_s23, %s185_s23 }
   0xd   :  { %p192_p6 = por %p191_p5, %p190_p4 }
   0xf   :  { %p193_p7 = pnand %p192_p6, %p186_p3 }
  0x11   :  { %196 = shalt.err (!%p193_p7)
}
  0x12   :  { %20 = dma.hbm_to_vmem [thread:$0]  %s320_s0, 128, %s18_s13, [#allocation3]  }
  0x13   :  { %s197_s28 = scalar_lea.hbm %s321_s1, 512 }
  0x14   :  { %p198_p8 = scmp.ne.s32.totalorder %s321_s1, %s197_s28  ;;  %p201_p9 = scmp.lt.u32.totalorder %s197_s28, %s321_s1 }
  0x16   :  { %p203_p10 = pnand %p201_p9, %p198_p8 }
  0x18   :  { %206 = shalt.err (!%p203_p10)
}
  0x19   :  { %s207_s6 = scalar_lea.vmem %s274_s15, 512  ;;  %p212_p12 = scmp.lt.s32.totalorder %s274_s15, %s274_s15 }
  0x1a   :  { %p208_p11 = scmp.ne.s32.totalorder %s274_s15, %s207_s6  ;;  %p213_p13 = scmp.lt.s32.totalorder %s207_s6, %s207_s6 }
  0x1c   :  { %p214_p0 = por %p213_p13, %p212_p12 }
  0x1e   :  { %p215_p1 = pnand %p214_p0, %p208_p11 }
  0x20   :  { %218 = shalt.err (!%p215_p1)
}
  0x21   :  { %s249_s0 = smov 256   ;;  %s250_s7 = smov 16  }
  0x22   :  { %32 = dma.hbm_to_vmem [thread:$0]  %s321_s1, 512, %s274_s15, [#allocation6], %s249_s0, %s249_s0, %s250_s7  }
  0x23   :  { %241 = dma.done.wait [#allocation3], 128  }
  0x24   :  { %242 = vsyncadd [#allocation3], 4294967168 }
  0x25   :  { %243 = dma.done.wait [#allocation6], 512  }
  0x26   :  { %244 = vsyncadd [#allocation6], 4294966784  ;;  %v251_v0 = vmov 0.0   ;;  %vm62_vm0 = vcmask 1041408   ;;  %vm252_vm1 = vmmov 1   ;;  %v43_v1 = vld [vmem:[#allocation5 + $0x8] sm:$0xff]  ;;  %v48_v8 = vlaneseq }
  0x27   :  { %133 = vmatprep.mubr.f32.mxu0 %v251_v0  ;;  %vm163_vm2 = vmpackc.low %vm62_vm0, %vm252_vm1  ;;  %v45_v2 = vld [vmem:[#allocation5 + $0x18] sm:$0x3]  ;;  %v42_v3 = vld [vmem:[#allocation5] sm:$0xff]  ;;  %vm58_vm3 = vcmask 80896   ;;  %s253_s11 = smov [#allocation7]   ;;  %vm141_vm4 = vcmask 695296  }
  0x28   :  { %v162_v4 = vpack.c.bf16 %v45_v2, %v43_v1  ;;  %v44_v5 = vld [vmem:[#allocation5 + $0x10] sm:$0x3]  ;;  %v41_v7 = vld [vmem:[#allocation2] sm:$0xff]  ;;  %v49_v9 = vshrl.u32 %v48_v8, 7  ;;  %s149_s12 = sshll.u32 %s253_s11, 4  ;;  %s150_s12 = int_to_ptr.vmem [resolvable:$true] %s149_s12 }
  0x29   :  { %v165_v6 = vpack.c.bf16 %v44_v5, %v42_v3  ;;  %v46_v11 = vld [vmem:[%s322_s2] sm:$0x3]  ;;  %s219_s13 = scalar_lea.vmem %s150_s12, 256  ;;  %p224_p3 = scmp.lt.s32.totalorder %s150_s12, %s150_s12 }
  0x2a   :  { %164 = vmatprep.subr.msk.bf16.mxu0 %vm163_vm2, %v162_v4  ;;  %v50_v10 = vsub.s32 0, %v49_v9  ;;  %v54_v12 = vsub.s32 1, %v49_v9  ;;  %p220_p2 = scmp.ne.s32.totalorder %s150_s12, %s219_s13  ;;  %p225_p4 = scmp.lt.s32.totalorder %s219_s13, %s219_s13 }
  0x2b   :  { %167 = vmatpush1.bf16.msk.msra.mxu0 %vm163_vm2, %v165_v6 }
  0x2c   :  { %v51_v13 = vrot.slane %v46_v11, %v50_v10  ;;  %v55_v14 = vrot.slane %v46_v11, %v54_v12  ;;  %p226_p5 = por %p225_p4, %p224_p3 }
  0x2e   :  { %161 = vmatmul.mubr.msk.f32.vlgmr.msra.gmra.mrb[0].mxu0 %vm58_vm3, %v41_v7  ;;  %p227_p6 = pnand %p226_p5, %p220_p2 }
 0x101   :  { %v135_v15 = vpop.f32.mrb[0].mxu0 }
 0x102   :  { %v136_v16 = vadd.f32 %v135_v15, %v51_v13  ;;  %v137_v17 = vpop.f32.mrb[1].mxu0 }
 0x103   :  { %v138_v18 = vadd.f32 %v137_v17, %v55_v14 }
 0x104   :  { %140 = vst [vmem:[#allocation7] sm:$0xff] %v136_v16 }
 0x105   :  { %142 = vst.msk [vmem:[#allocation7 + $0x8] sm:$0xff] %vm141_vm4, %v138_v18 }
 0x106   :  { %230 = shalt.err (!%p227_p6)
}
 0x107   :  { %s231_s15 = scalar_lea.hbm %s323_s3, 256 }
 0x108   :  { %p232_p7 = scmp.ne.s32.totalorder %s323_s3, %s231_s15  ;;  %p235_p8 = scmp.lt.u32.totalorder %s231_s15, %s323_s3 }
 0x10a   :  { %p237_p9 = pnand %p235_p8, %p232_p7 }
 0x10c   :  { %240 = shalt.err (!%p237_p9)
}
 0x10d   :  { %152 = dma.vmem_to_hbm [thread:$0]  %s150_s12, 256, %s323_s3, [#allocation4]  }
 0x10e   :  { %245 = dma.done.wait [#allocation4], 256  }
 0x10f   :  { %246 = vsyncadd [#allocation4], 4294967040 }
 0x110   :  { %156 = vsyncpa [#allocation3], 1 }
 0x111   :  { %157 = vsyncpa [#allocation6], 1 }
 0x112   :  { %158 = vsyncpa [#allocation4], 1 }

</bundles_post_ra>
